<compile_context>
chip_gen: v7x
topology: tpu7x:2x2x1
jax: 0.10.0
libtpu: 0.0.40
codegen_flags: <defaults>
</compile_context>

<pallas_src>
import jax
import jax.numpy as jnp
from jax.experimental import pallas as pl
from jax.experimental.pallas import tpu as pltpu

EPS = 1e-5  # nn.BatchNorm2d default eps


def _round_up(x, m):
    return (x + m - 1) // m * m


def _vmem_config():
    """(vmem_limit_bytes, tile_budget_bytes), safe on v5e/v6e (128 MiB) and v7x (64 MiB)."""
    cap = 64 * (1 << 20)
    try:
        cap = pltpu.get_tpu_info().vmem_capacity_bytes
    except Exception:
        pass  # fall back to the v7x-safe assumption
    limit = min(64 * (1 << 20), cap // 2)        # 64 MiB on v5e/v6e, 32 MiB on v7x
    budget = max((limit * 3) // 4, 12 * (1 << 20))
    return limit, budget


def _pick_row_tile(m, c, kp, budget_bytes):
    """Largest MXU-friendly row tile whose VMEM footprint fits the budget."""
    c_eff = max(_round_up(c, 128), 128)          # lane-padded VMEM footprint of C

    def est(tm):
        return 4 * (2 * 4 * tm * c_eff           # double-buffered (4, tm, C) input block
                    + 2 * tm * kp                # double-buffered (tm, Kp) output block
                    + 2 * c_eff * kp             # conv weight
                    + 4 * c_eff)                 # scale / shift vectors

    cap = _round_up(min(m, 1 << 15), 8)          # no point tiling past (padded) M
    for tm in (4096, 2048, 1024, 512, 256, 128, 64, 32, 16, 8):
        if tm <= cap and est(tm) <= budget_bytes:
            return tm
    return 8


# ---------------------------------------------------------------------------
# One-pass kernel: BN affine + ReLU for the 4 window positions (summed in
# registers), then a single (tm, C) @ (C, Kp) MXU matmul.  The 1/4 avg-pool
# factor is folded into w, so acc @ w == avg_pool2x2(relu(bn(x))) @ conv_w.
# ---------------------------------------------------------------------------
def _transition_kernel(x_ref, scale_ref, shift_ref, w_ref, out_ref):
    scale = scale_ref[...]                                          # (1, C)
    shift = shift_ref[...]                                          # (1, C)
    acc = jnp.maximum(x_ref[0].astype(jnp.float32) * scale + shift, 0.0)
    for k in range(1, 4):                                           # unrolled, in registers
        acc = acc + jnp.maximum(x_ref[k].astype(jnp.float32) * scale + shift, 0.0)
    # TODO(synk): cast acc / w to bf16 here on v6e/v7x for native-MXU matmul.
    out_ref[...] = jnp.dot(
        acc, w_ref[...], preferred_element_type=jnp.float32
    ).astype(out_ref.dtype)


def transition_forward(x, gamma, beta, conv_w):
    """x: (N, C, H, W) NCHW float32;  conv_w: (Cout, C, 1, 1).  Returns NCHW."""
    N, C, H, W = x.shape
    Cout = conv_w.shape[0]
    assert H % 2 == 0 and W % 2 == 0, "Transition expects even H, W"
    Ho, Wo = H // 2, W // 2
    M = N * Ho * Wo
    Kp = Cout if Cout % 128 == 0 else _round_up(max(Cout, 128), 128)  # lane-dense stores

    # ---- BatchNorm batch statistics via XLA (fused with the layout copy) ----
    mean = jnp.mean(x.astype(jnp.float32), axis=(0, 2, 3))                       # (C,)
    var = jnp.mean(jnp.square(x.astype(jnp.float32)
                              - mean[None, :, None, None]), axis=(0, 2, 3))      # biased
    inv_std = jax.lax.rsqrt(var + EPS)
    scale = (gamma.astype(jnp.float32) * inv_std).reshape(1, C)
    shift = (beta.astype(jnp.float32) - mean * gamma.astype(jnp.float32) * inv_std).reshape(1, C)

    # Single fused layout pass: NCHW -> window-major channels-last (4, M, C).
    x_win = (
        x.reshape(N, C, Ho, 2, Wo, 2)
        .transpose(3, 5, 0, 2, 4, 1)      # (dh, dw, N, Ho, Wo, C)
        .reshape(4, M, C)
    )

    vmem_limit, budget = _vmem_config()
    tm = _pick_row_tile(M, C, Kp, budget)
    Mp = _round_up(M, tm)
    if Mp > M:
        # Padded rows become max(shift, 0) after the affine+ReLU; they are
        # sliced off the output below, so zero-padding here is safe.
        x_win = jnp.pad(x_win, ((0, 0), (0, Mp - M), (0, 0)))
    grid = (Mp // tm,)

    # Conv weight: transposed, zero-padded to lane-dense Kp, 0.25 pool factor folded in.
    w = 0.25 * jnp.pad(conv_w[:, :, 0, 0].T.astype(jnp.float32),
                       ((0, 0), (0, Kp - Cout)))

    cost = pl.CostEstimate(
        flops=2 * Mp * C * Kp + 3 * 4 * Mp * C,
        transcendentals=0,
        bytes_accessed=4 * (4 * Mp * C + Mp * Kp + C * Kp + 4 * C),
    )

    out_flat = pl.pallas_call(
        _transition_kernel,
        out_shape=jax.ShapeDtypeStruct((Mp, Kp), x.dtype),
        grid=grid,
        in_specs=[pl.BlockSpec((4, tm, C), lambda i: (0, i, 0)),     # x window block
                  pl.BlockSpec((1, C), lambda i: (0, 0)),            # scale
                  pl.BlockSpec((1, C), lambda i: (0, 0)),            # shift
                  pl.BlockSpec((C, Kp), lambda i: (0, 0))],          # weight
        out_specs=pl.BlockSpec((tm, Kp), lambda i: (i, 0)),
        compiler_params=pltpu.CompilerParams(
            dimension_semantics=("parallel",),
            vmem_limit_bytes=vmem_limit),
        cost_estimate=cost,
    )(x_win, scale, shift, w)

    # Slice off padded rows / channels, back to NCHW (small output-side copy).
    return out_flat[:M, :Cout].reshape(N, Ho, Wo, Cout).transpose(0, 3, 1, 2)


def transition_reference(x, gamma, beta, conv_w):
    """Pure-JAX reference replicating the PyTorch forward (training-mode BN)."""
    mean = jnp.mean(x, axis=(0, 2, 3), keepdims=True)
    var = jnp.mean((x - mean) ** 2, axis=(0, 2, 3), keepdims=True)
    xn = (x - mean) * jax.lax.rsqrt(var + EPS)
    y = jnp.maximum(xn * gamma[None, :, None, None] + beta[None, :, None, None], 0.0)
    conv = jnp.einsum("nchw,oc->nohw", y, conv_w[:, :, 0, 0])
    n, co, h, w = conv.shape
    return conv.reshape(n, co, h // 2, 2, w // 2, 2).mean(axis=(3, 5))


if __name__ == "__main__":
    # Small shapes consistent with the module: Transition(nChannels=4, nOutChannels=8)
    N, C, H, W = 2, 4, 16, 16
    Cout = 8

    key = jax.random.PRNGKey(0)
    kx, kg, kb, kw = jax.random.split(key, 4)
    x = jax.random.normal(kx, (N, C, H, W), dtype=jnp.float32)
    gamma = 1.0 + 0.1 * jax.random.normal(kg, (C,), dtype=jnp.float32)
    beta = 0.1 * jax.random.normal(kb, (C,), dtype=jnp.float32)
    conv_w = jax.random.normal(kw, (Cout, C, 1, 1), dtype=jnp.float32) * (1.0 / (C ** 0.5))

    fwd = jax.jit(transition_forward)
    out = jax.block_until_ready(fwd(x, gamma, beta, conv_w))

    ref = transition_reference(x, gamma, beta, conv_w)
    assert out.shape == (N, Cout, H // 2, W // 2), out.shape
    assert jnp.allclose(out, ref, atol=2e-4, rtol=2e-4), float(jnp.max(jnp.abs(out - ref)))

    print("KERNEL_OK")
</pallas_src>

<mosaic_0001>
module attributes {stable_mosaic.version = 11 : i64} {
  func.func @_transition_kernel(%arg0: i32, %arg1: memref<4x128x4xf32, #tpu.memory_space<vmem>>, %arg2: memref<1x4xf32, #tpu.memory_space<vmem>>, %arg3: memref<1x4xf32, #tpu.memory_space<vmem>>, %arg4: memref<4x128xf32, #tpu.memory_space<vmem>>, %arg5: memref<128x128xf32, #tpu.memory_space<vmem>>) attributes {dimension_semantics = [#tpu.dimension_semantics<parallel>], iteration_bounds = array<i64: 1>, scalar_prefetch = 0 : i64, scratch_operands = 0 : i64, tpu.core_type = #tpu.core_type<tc>, window_params = [{transform_indices = @transform_0, window_bounds = array<i64: 4, 128, 4>}, {pipeline_mode = #tpu.pipeline_mode<synchronous>, transform_indices = @transform_1, window_bounds = array<i64: 1, 4>}, {pipeline_mode = #tpu.pipeline_mode<synchronous>, transform_indices = @transform_2, window_bounds = array<i64: 1, 4>}, {pipeline_mode = #tpu.pipeline_mode<synchronous>, transform_indices = @transform_3, window_bounds = array<i64: 4, 128>}, {transform_indices = @transform_4, window_bounds = array<i64: 128, 128>}]} {
    %c0 = arith.constant 0 : index
    %c0_0 = arith.constant 0 : index
    %0 = vector.load %arg2[%c0, %c0_0] : memref<1x4xf32, #tpu.memory_space<vmem>>, vector<1x4xf32>
    %c0_1 = arith.constant 0 : index
    %c0_2 = arith.constant 0 : index
    %1 = vector.load %arg3[%c0_1, %c0_2] : memref<1x4xf32, #tpu.memory_space<vmem>>, vector<1x4xf32>
    %c0_3 = arith.constant 0 : index
    %c0_4 = arith.constant 0 : index
    %c0_5 = arith.constant 0 : index
    %2 = vector.load %arg1[%c0_3, %c0_4, %c0_5] : memref<4x128x4xf32, #tpu.memory_space<vmem>>, vector<1x128x4xf32>
    %3 = vector.shape_cast %2 : vector<1x128x4xf32> to vector<128x4xf32>
    %4 = vector.broadcast %0 : vector<1x4xf32> to vector<128x4xf32>
    %5 = arith.mulf %3, %4 : vector<128x4xf32>
    %6 = vector.broadcast %1 : vector<1x4xf32> to vector<128x4xf32>
    %7 = arith.addf %5, %6 : vector<128x4xf32>
    %cst = arith.constant 0.000000e+00 : f32
    %8 = vector.broadcast %cst : f32 to vector<128x4xf32>
    %9 = arith.maximumf %7, %8 : vector<128x4xf32>
    %c1 = arith.constant 1 : index
    %c0_6 = arith.constant 0 : index
    %c0_7 = arith.constant 0 : index
    %10 = vector.load %arg1[%c1, %c0_6, %c0_7] : memref<4x128x4xf32, #tpu.memory_space<vmem>>, vector<1x128x4xf32>
    %11 = vector.shape_cast %10 : vector<1x128x4xf32> to vector<128x4xf32>
    %12 = vector.broadcast %0 : vector<1x4xf32> to vector<128x4xf32>
    %13 = arith.mulf %11, %12 : vector<128x4xf32>
    %14 = vector.broadcast %1 : vector<1x4xf32> to vector<128x4xf32>
    %15 = arith.addf %13, %14 : vector<128x4xf32>
    %cst_8 = arith.constant 0.000000e+00 : f32
    %16 = vector.broadcast %cst_8 : f32 to vector<128x4xf32>
    %17 = arith.maximumf %15, %16 : vector<128x4xf32>
    %18 = arith.addf %9, %17 : vector<128x4xf32>
    %c2 = arith.constant 2 : index
    %c0_9 = arith.constant 0 : index
    %c0_10 = arith.constant 0 : index
    %19 = vector.load %arg1[%c2, %c0_9, %c0_10] : memref<4x128x4xf32, #tpu.memory_space<vmem>>, vector<1x128x4xf32>
    %20 = vector.shape_cast %19 : vector<1x128x4xf32> to vector<128x4xf32>
    %21 = vector.broadcast %0 : vector<1x4xf32> to vector<128x4xf32>
    %22 = arith.mulf %20, %21 : vector<128x4xf32>
    %23 = vector.broadcast %1 : vector<1x4xf32> to vector<128x4xf32>
    %24 = arith.addf %22, %23 : vector<128x4xf32>
    %cst_11 = arith.constant 0.000000e+00 : f32
    %25 = vector.broadcast %cst_11 : f32 to vector<128x4xf32>
    %26 = arith.maximumf %24, %25 : vector<128x4xf32>
    %27 = arith.addf %18, %26 : vector<128x4xf32>
    %c3 = arith.constant 3 : index
    %c0_12 = arith.constant 0 : index
    %c0_13 = arith.constant 0 : index
    %28 = vector.load %arg1[%c3, %c0_12, %c0_13] : memref<4x128x4xf32, #tpu.memory_space<vmem>>, vector<1x128x4xf32>
    %29 = vector.shape_cast %28 : vector<1x128x4xf32> to vector<128x4xf32>
    %30 = vector.broadcast %0 : vector<1x4xf32> to vector<128x4xf32>
    %31 = arith.mulf %29, %30 : vector<128x4xf32>
    %32 = vector.broadcast %1 : vector<1x4xf32> to vector<128x4xf32>
    %33 = arith.addf %31, %32 : vector<128x4xf32>
    %cst_14 = arith.constant 0.000000e+00 : f32
    %34 = vector.broadcast %cst_14 : f32 to vector<128x4xf32>
    %35 = arith.maximumf %33, %34 : vector<128x4xf32>
    %36 = arith.addf %27, %35 : vector<128x4xf32>
    %c0_15 = arith.constant 0 : index
    %c0_16 = arith.constant 0 : index
    %37 = vector.load %arg4[%c0_15, %c0_16] : memref<4x128xf32, #tpu.memory_space<vmem>>, vector<4x128xf32>
    %cst_17 = arith.constant dense<0.000000e+00> : vector<128x128xf32>
    %38 = tpu.matmul %36, %37, %cst_17 {dimension_numbers = #tpu.dot_dimension_numbers<[1], [0], [0], [1], [0, 0, 1, 1], [], []>} : vector<128x4xf32>, vector<4x128xf32>, vector<128x128xf32> -> vector<128x128xf32>
    %c0_18 = arith.constant 0 : index
    %c0_19 = arith.constant 0 : index
    %39 = vector.load %arg5[%c0_18, %c0_19] : memref<128x128xf32, #tpu.memory_space<vmem>>, vector<128x128xf32>
    tpu.vector_store %arg5[%c0_18, %c0_19], %38 {strides = array<i32>} : memref<128x128xf32, #tpu.memory_space<vmem>>, vector<128x128xf32>,
    return
  }
  func.func @transform_0(%arg0: i32) -> (i32, i32, i32) {
    %c0_i32 = arith.constant 0 : i32
    %c0_i32_0 = arith.constant 0 : i32
    %c0_i32_1 = arith.constant 0 : i32
    return %c0_i32, %arg0, %c0_i32_0 : i32, i32, i32
  }
  func.func @transform_1(%arg0: i32) -> (i32, i32) {
    %c0_i32 = arith.constant 0 : i32
    %c0_i32_0 = arith.constant 0 : i32
    %c0_i32_1 = arith.constant 0 : i32
    return %c0_i32, %c0_i32_0 : i32, i32
  }
  func.func @transform_2(%arg0: i32) -> (i32, i32) {
    %c0_i32 = arith.constant 0 : i32
    %c0_i32_0 = arith.constant 0 : i32
    %c0_i32_1 = arith.constant 0 : i32
    return %c0_i32, %c0_i32_0 : i32, i32
  }
  func.func @transform_3(%arg0: i32) -> (i32, i32) {
    %c0_i32 = arith.constant 0 : i32
    %c0_i32_0 = arith.constant 0 : i32
    %c0_i32_1 = arith.constant 0 : i32
    return %c0_i32, %c0_i32_0 : i32, i32
  }
  func.func @transform_4(%arg0: i32) -> (i32, i32) {
    %c0_i32 = arith.constant 0 : i32
    %c0_i32_0 = arith.constant 0 : i32
    return %arg0, %c0_i32 : i32, i32
  }
}

</mosaic_0001>

<bundles_post_ra>
// kernel: transition_forward.1
= control target key start
LH: loop header
LB: loop body
LE: loop exit
PB: predicated region body
PF: predicated region fallthrough
CT: control target
= control target key end

     0   :  { %vm388_vm0 = vcmask 1043456   ;;  %vm339_vm1 = vcmask 31744   ;;  %s1091_s3 = inlined_call_operand.vmem [shape: f32[4,128], index: 3, kind: input, shape index: {}]   ;;  %s1092_s0 = inlined_call_operand.vmem [shape: f32[4,128,4], index: 0, kind: input, shape index: {}]   ;;  %s1093_s1 = inlined_call_operand.vmem [shape: f32[1,4], index: 1, kind: input, shape index: {}]   ;;  %s1094_s2 = inlined_call_operand.vmem [shape: f32[1,4], index: 2, kind: input, shape index: {}]   ;;  %s1095_s4 = inlined_call_operand.vmem [shape: f32[128,128], index: 4, kind: output, shape index: {}]  }
   0x1   :  { %v338_v0 = vld [vmem:[%s1091_s3] sm:$0xf]  ;;  %v20_v25 = vld [vmem:[%s1092_s0 + $0x8] sm:$0xff]  ;;  %v21_v61 = vld [vmem:[%s1092_s0 + $0x10] sm:$0xff] }
   0x2   :  { %v700_v1 = vld [vmem:[%s1093_s1] ss:$0 sm:$0xff]  ;;  %641 = vmatprep.subr.msk.mxu0 %vm388_vm0, %v338_v0  ;;  %667 = vmatprep.subr.msk.mxu1 %vm388_vm0, %v338_v0  ;;  %v560_v26 = vld [vmem:[%s1092_s0 + $0x88] sm:$0xff]  ;;  %v561_v62 = vld [vmem:[%s1092_s0 + $0x90] sm:$0xff] }
   0x3   :  { %v705_v2 = vld [vmem:[%s1094_s2] ss:$0 sm:$0xff]  ;;  %642 = vmatpush3.msk.msra.mxu0 %vm388_vm0, %v338_v0  ;;  %668 = vmatpush3.msk.msra.mxu1 %vm388_vm0, %v338_v0  ;;  %v576_v31 = vld [vmem:[%s1092_s0 + $0x108] sm:$0xff]  ;;  %v42_v40 = vmul.f32 %v700_v1, %v20_v25  ;;  %v113_v41 = vmul.f32 %v560_v26, %v700_v1  ;;  %v577_v63 = vld [vmem:[%s1092_s0 + $0x110] sm:$0xff] }
   0x4   :  { %v19_v3 = vld [vmem:[%s1092_s0] sm:$0xff]  ;;  %v592_v32 = vld [vmem:[%s1092_s0 + $0x188] sm:$0xff]  ;;  %v194_v45 = vmul.f32 %v576_v31, %v700_v1  ;;  %v585_v25 = vld [vmem:[%s1092_s0 + $0x150] sm:$0xff] }
   0x5   :  { %v559_v4 = vld [vmem:[%s1092_s0 + $0x80] sm:$0xff]  ;;  %v41_v6 = vmul.f32 %v700_v1, %v19_v3  ;;  %v28_v37 = vld [vmem:[%s1092_s0 + $0x48] sm:$0xff]  ;;  %v275_v46 = vmul.f32 %v592_v32, %v700_v1  ;;  %v64_v48 = vadd.f32 %v705_v2, %v42_v40  ;;  %v129_v49 = vadd.f32 %v705_v2, %v113_v41  ;;  %v22_v31 = vld [vmem:[%s1092_s0 + $0x18] sm:$0xff] }
   0x6   :  { %v575_v5 = vld [vmem:[%s1092_s0 + $0x100] sm:$0xff]  ;;  %v112_v7 = vmul.f32 %v559_v4, %v700_v1  ;;  %v568_v42 = vld [vmem:[%s1092_s0 + $0xc8] sm:$0xff]  ;;  %v50_v50 = vmul.f32 %v700_v1, %v28_v37  ;;  %v210_v52 = vadd.f32 %v705_v2, %v194_v45  ;;  %v203_v40 = vmul.f32 %v585_v25, %v700_v1  ;;  %v578_v45 = vld [vmem:[%s1092_s0 + $0x118] sm:$0xff] }
   0x7   :  { %v193_v8 = vmul.f32 %v575_v5, %v700_v1  ;;  %v591_v9 = vld [vmem:[%s1092_s0 + $0x180] sm:$0xff]  ;;  %v63_v17 = vadd.f32 %v705_v2, %v41_v6  ;;  %v291_v53 = vadd.f32 %v705_v2, %v275_v46  ;;  %v121_v54 = vmul.f32 %v568_v42, %v700_v1  ;;  %v584_v55 = vld [vmem:[%s1092_s0 + $0x148] sm:$0xff]  ;;  %v593_v6 = vld [vmem:[%s1092_s0 + $0x190] sm:$0xff] }
   0x8   :  { %v27_v10 = vld [vmem:[%s1092_s0 + $0x40] sm:$0xff]  ;;  %v274_v12 = vmul.f32 %v591_v9, %v700_v1  ;;  %v128_v18 = vadd.f32 %v705_v2, %v112_v7  ;;  %v600_v56 = vld [vmem:[%s1092_s0 + $0x1c8] sm:$0xff]  ;;  %v80_v58 = vmax.f32 %v64_v48, 0.0  ;;  %v145_v59 = vmax.f32 %v129_v49, 0.0 }
   0x9   :  { %v567_v11 = vld [vmem:[%s1092_s0 + $0xc0] sm:$0xff]  ;;  %v49_v13 = vmul.f32 %v700_v1, %v27_v10  ;;  %v209_v19 = vadd.f32 %v705_v2, %v193_v8  ;;  %v79_v27 = vmax.f32 %v63_v17, 0.0  ;;  %v72_v60 = vadd.f32 %v705_v2, %v50_v50  ;;  %v594_v50 = vld [vmem:[%s1092_s0 + $0x198] sm:$0xff] }
   0xa   :  { %v120_v14 = vmul.f32 %v567_v11, %v700_v1  ;;  %v583_v15 = vld [vmem:[%s1092_s0 + $0x140] sm:$0xff]  ;;  %v290_v21 = vadd.f32 %v705_v2, %v274_v12  ;;  %v144_v28 = vmax.f32 %v128_v18, 0.0  ;;  %v226_v3 = vmax.f32 %v210_v52, 0.0 }
   0xb   :  { %v599_v16 = vld [vmem:[%s1092_s0 + $0x1c0] sm:$0xff]  ;;  %v201_v20 = vmul.f32 %v583_v15, %v700_v1  ;;  %v71_v22 = vadd.f32 %v705_v2, %v49_v13  ;;  %v225_v29 = vmax.f32 %v209_v19, 0.0  ;;  %v307_v4 = vmax.f32 %v291_v53, 0.0  ;;  %v29_v19 = vld [vmem:[%s1092_s0 + $0x50] sm:$0xff] }
   0xc   :  { %v136_v23 = vadd.f32 %v705_v2, %v120_v14  ;;  %v282_v24 = vmul.f32 %v599_v16, %v700_v1  ;;  %v306_v33 = vmax.f32 %v290_v21, 0.0  ;;  %v160_v38 = vadd.f32 %v144_v28, %v79_v27 }
   0xd   :  { %v217_v30 = vadd.f32 %v705_v2, %v201_v20  ;;  %v87_v34 = vmax.f32 %v71_v22, 0.0  ;;  %v137_v5 = vadd.f32 %v705_v2, %v121_v54  ;;  %v161_v7 = vadd.f32 %v145_v59, %v80_v58 }
   0xe   :  { %v152_v35 = vmax.f32 %v136_v23, 0.0  ;;  %v298_v36 = vadd.f32 %v705_v2, %v282_v24  ;;  %v241_v47 = vadd.f32 %v225_v29, %v160_v38  ;;  %v88_v8 = vmax.f32 %v72_v60, 0.0  ;;  %v569_v24 = vld [vmem:[%s1092_s0 + $0xd0] sm:$0xff]  ;;  %v570_v60 = vld [vmem:[%s1092_s0 + $0xd8] sm:$0xff] }
   0xf   :  { %v233_v39 = vmax.f32 %v217_v30, 0.0  ;;  %v202_v9 = vmul.f32 %v584_v55, %v700_v1  ;;  %v283_v10 = vmul.f32 %v600_v56, %v700_v1  ;;  %v153_v11 = vmax.f32 %v137_v5, 0.0  ;;  %v601_v30 = vld [vmem:[%s1092_s0 + $0x1d0] sm:$0xff]  ;;  %v30_v55 = vld [vmem:[%s1092_s0 + $0x58] sm:$0xff] }
  0x10   :  { %v168_v43 = vadd.f32 %v152_v35, %v87_v34  ;;  %v314_v44 = vmax.f32 %v298_v36, 0.0  ;;  %v322_v57 = vadd.f32 %v306_v33, %v241_v47  ;;  %v43_v12 = vmul.f32 %v700_v1, %v21_v61  ;;  %v562_v36 = vld [vmem:[%s1092_s0 + $0x98] sm:$0xff] }
  0x11   :  { %v114_v13 = vmul.f32 %v561_v62, %v700_v1  ;;  %v195_v14 = vmul.f32 %v577_v63, %v700_v1  ;;  %v242_v15 = vadd.f32 %v226_v3, %v161_v7  ;;  %v218_v16 = vadd.f32 %v705_v2, %v202_v9  ;;  %v586_v61 = vld [vmem:[%s1092_s0 + $0x158] sm:$0xff] }
  0x12   :  { %v249_v51 = vadd.f32 %v233_v39, %v168_v43  ;;  %643 = vmatprep.mubr.msk.f32.mxu0 %vm339_vm1, %v322_v57  ;;  %v299_v17 = vadd.f32 %v705_v2, %v283_v10  ;;  %v276_v18 = vmul.f32 %v593_v6, %v700_v1  ;;  %v169_v20 = vadd.f32 %v153_v11, %v88_v8  ;;  %v602_v62 = vld [vmem:[%s1092_s0 + $0x1d8] sm:$0xff] }
  0x13   :  { %v65_v21 = vadd.f32 %v705_v2, %v43_v12  ;;  %v130_v22 = vadd.f32 %v705_v2, %v114_v13  ;;  %v211_v23 = vadd.f32 %v705_v2, %v195_v14  ;;  %v323_v26 = vadd.f32 %v307_v4, %v242_v15  ;;  %v23_v13 = vld [vmem:[%s1092_s0 + $0x20] sm:$0xff] }
  0x14   :  { %v330_v0 = vadd.f32 %v314_v44, %v249_v51  ;;  %v234_v27 = vmax.f32 %v218_v16, 0.0  ;;  %v315_v28 = vmax.f32 %v299_v17, 0.0  ;;  %v292_v29 = vadd.f32 %v705_v2, %v276_v18  ;;  %v563_v18 = vld [vmem:[%s1092_s0 + $0xa0] sm:$0xff] }
  0x15   :  { %v81_v32 = vmax.f32 %v65_v21, 0.0  ;;  %v146_v33 = vmax.f32 %v130_v22, 0.0  ;;  %v227_v34 = vmax.f32 %v211_v23, 0.0  ;;  %v51_v35 = vmul.f32 %v700_v1, %v29_v19  ;;  %644 = vmatmul.mubr.msk.f32.vlgmr.msra.gmra.mrb[0].mxu0 %vm339_vm1, %v323_v26  ;;  %v579_v23 = vld [vmem:[%s1092_s0 + $0x120] sm:$0xff] }
  0x16   :  { %655 = vmatprep.mubr.msk.f32.mxu1 %vm339_vm1, %v330_v0  ;;  %v250_v37 = vadd.f32 %v234_v27, %v169_v20  ;;  %v308_v38 = vmax.f32 %v292_v29, 0.0  ;;  %v122_v39 = vmul.f32 %v569_v24, %v700_v1  ;;  %v284_v43 = vmul.f32 %v601_v30, %v700_v1  ;;  %v595_v24 = vld [vmem:[%s1092_s0 + $0x1a0] sm:$0xff] }
  0x17   :  { %v162_v41 = vadd.f32 %v146_v33, %v81_v32  ;;  %v73_v42 = vadd.f32 %v705_v2, %v51_v35  ;;  %v44_v44 = vmul.f32 %v700_v1, %v22_v31  ;;  %v219_v48 = vadd.f32 %v705_v2, %v203_v40  ;;  %v31_v29 = vld [vmem:[%s1092_s0 + $0x60] sm:$0xff] }
  0x18   :  { %v331_v46 = vadd.f32 %v315_v28, %v250_v37  ;;  %v138_v47 = vadd.f32 %v705_v2, %v122_v39  ;;  %v115_v49 = vmul.f32 %v562_v36, %v700_v1  ;;  %v300_v53 = vadd.f32 %v705_v2, %v284_v43  ;;  %v571_v30 = vld [vmem:[%s1092_s0 + $0xe0] sm:$0xff] }
  0x19   :  { %v243_v51 = vadd.f32 %v227_v34, %v162_v41  ;;  %v89_v52 = vmax.f32 %v73_v42, 0.0  ;;  %v66_v54 = vadd.f32 %v705_v2, %v44_v44  ;;  %v235_v57 = vmax.f32 %v219_v48, 0.0  ;;  %v587_v35 = vld [vmem:[%s1092_s0 + $0x160] sm:$0xff] }
  0x1a   :  { %656 = vmatmul.mubr.msk.f32.vlgmr.msra.gmra.mrb[0].mxu1 %vm339_vm1, %v331_v46  ;;  %v154_v56 = vmax.f32 %v138_v47, 0.0  ;;  %v131_v58 = vadd.f32 %v705_v2, %v115_v49  ;;  %v196_v59 = vmul.f32 %v578_v45, %v700_v1  ;;  %v316_v0 = vmax.f32 %v300_v53, 0.0  ;;  %v603_v44 = vld [vmem:[%s1092_s0 + $0x1e0] sm:$0xff]  ;;  %v24_v53 = vld [vmem:[%s1092_s0 + $0x28] sm:$0xff] }
  0x1b   :  { %v324_v63 = vadd.f32 %v308_v38, %v243_v51  ;;  %v82_v3 = vmax.f32 %v66_v54, 0.0  ;;  %v277_v4 = vmul.f32 %v594_v50, %v700_v1  ;;  %v52_v8 = vmul.f32 %v700_v1, %v30_v55  ;;  %v564_v54 = vld [vmem:[%s1092_s0 + $0xa8] sm:$0xff] }
  0x1c   :  { %v170_v5 = vadd.f32 %v154_v56, %v89_v52  ;;  %v147_v6 = vmax.f32 %v131_v58, 0.0  ;;  %v212_v7 = vadd.f32 %v705_v2, %v196_v59  ;;  %v123_v10 = vmul.f32 %v570_v60, %v700_v1  ;;  %v580_v59 = vld [vmem:[%s1092_s0 + $0x128] sm:$0xff] }
  0x1d   :  { %646 = vmatprep.mubr.msk.f32.mxu0 %vm339_vm1, %v324_v63  ;;  %v293_v9 = vadd.f32 %v705_v2, %v277_v4  ;;  %v204_v11 = vmul.f32 %v586_v61, %v700_v1  ;;  %v285_v12 = vmul.f32 %v602_v62, %v700_v1  ;;  %v74_v17 = vadd.f32 %v705_v2, %v52_v8  ;;  %v596_v60 = vld [vmem:[%s1092_s0 + $0x1a8] sm:$0xff] }
  0x1e   :  { %v251_v14 = vadd.f32 %v235_v57, %v170_v5  ;;  %v163_v15 = vadd.f32 %v147_v6, %v82_v3  ;;  %v228_v16 = vmax.f32 %v212_v7, 0.0  ;;  %v139_v20 = vadd.f32 %v705_v2, %v123_v10  ;;  %v32_v3 = vld [vmem:[%s1092_s0 + $0x68] sm:$0xff] }
  0x1f   :  { %v309_v19 = vmax.f32 %v293_v9, 0.0  ;;  %v220_v21 = vadd.f32 %v705_v2, %v204_v11  ;;  %v301_v22 = vadd.f32 %v705_v2, %v285_v12  ;;  %v90_v27 = vmax.f32 %v74_v17, 0.0  ;;  %v572_v12 = vld [vmem:[%s1092_s0 + $0xe8] sm:$0xff] }
  0x20   :  { %v332_v25 = vadd.f32 %v316_v0, %v251_v14  ;;  %v244_v26 = vadd.f32 %v228_v16, %v163_v15  ;;  %v45_v28 = vmul.f32 %v700_v1, %v23_v13  ;;  %v155_v31 = vmax.f32 %v139_v20, 0.0  ;;  %v588_v17 = vld [vmem:[%s1092_s0 + $0x168] sm:$0xff] }
  0x21   :  { %v236_v32 = vmax.f32 %v220_v21, 0.0  ;;  %v317_v33 = vmax.f32 %v301_v22, 0.0  ;;  %v116_v34 = vmul.f32 %v563_v18, %v700_v1  ;;  %v197_v38 = vmul.f32 %v579_v23, %v700_v1  ;;  %v604_v22 = vld [vmem:[%s1092_s0 + $0x1e8] sm:$0xff] }
  0x22   :  { %658 = vmatprep.mubr.msk.f32.mxu1 %vm339_vm1, %v332_v25  ;;  %v325_v36 = vadd.f32 %v309_v19, %v244_v26  ;;  %v67_v37 = vadd.f32 %v705_v2, %v45_v28  ;;  %v278_v39 = vmul.f32 %v595_v24, %v700_v1  ;;  %v171_v40 = vadd.f32 %v155_v31, %v90_v27  ;;  %v25_v27 = vld [vmem:[%s1092_s0 + $0x30] sm:$0xff] }
  0x23   :  { %v132_v41 = vadd.f32 %v705_v2, %v116_v34  ;;  %v53_v42 = vmul.f32 %v700_v1, %v31_v29  ;;  %v124_v43 = vmul.f32 %v571_v30, %v700_v1  ;;  %v213_v46 = vadd.f32 %v705_v2, %v197_v38  ;;  %v565_v28 = vld [vmem:[%s1092_s0 + $0xb0] sm:$0xff] }
  0x24   :  { %647 = vmatmul.mubr.msk.f32.gmra.mrb[2].mxu0 %vm339_vm1, %v325_v36  ;;  %v83_v45 = vmax.f32 %v67_v37, 0.0  ;;  %v294_v47 = vadd.f32 %v705_v2, %v278_v39  ;;  %v205_v48 = vmul.f32 %v587_v35, %v700_v1  ;;  %v252_v49 = vadd.f32 %v236_v32, %v171_v40  ;;  %v581_v29 = vld [vmem:[%s1092_s0 + $0x130] sm:$0xff] }
  0x25   :  { %v148_v50 = vmax.f32 %v132_v41, 0.0  ;;  %v75_v51 = vadd.f32 %v705_v2, %v53_v42  ;;  %v140_v52 = vadd.f32 %v705_v2, %v124_v43  ;;  %v229_v55 = vmax.f32 %v213_v46, 0.0  ;;  %v597_v34 = vld [vmem:[%s1092_s0 + $0x1b0] sm:$0xff] }
  0x26   :  { %v310_v56 = vmax.f32 %v294_v47, 0.0  ;;  %v221_v57 = vadd.f32 %v705_v2, %v205_v48  ;;  %v286_v58 = vmul.f32 %v603_v44, %v700_v1  ;;  %v333_v61 = vadd.f32 %v317_v33, %v252_v49  ;;  %v33_v47 = vld [vmem:[%s1092_s0 + $0x70] sm:$0xff] }
  0x27   :  { %v164_v62 = vadd.f32 %v148_v50, %v83_v45  ;;  %v91_v63 = vmax.f32 %v75_v51, 0.0  ;;  %v156_v0 = vmax.f32 %v140_v52, 0.0  ;;  %v46_v6 = vmul.f32 %v700_v1, %v24_v53  ;;  %v573_v52 = vld [vmem:[%s1092_s0 + $0xf0] sm:$0xff] }
  0x28   :  { %v237_v4 = vmax.f32 %v221_v57, 0.0  ;;  %v302_v5 = vadd.f32 %v705_v2, %v286_v58  ;;  %v117_v7 = vmul.f32 %v564_v54, %v700_v1  ;;  %659 = vmatmul.mubr.msk.f32.gmra.mrb[2].mxu1 %vm339_vm1, %v333_v61  ;;  %v198_v10 = vmul.f32 %v580_v59, %v700_v1  ;;  %v589_v53 = vld [vmem:[%s1092_s0 + $0x170] sm:$0xff]  ;;  %v26_v59 = vld [vmem:[%s1092_s0 + $0x38] sm:$0xff] }
  0x29   :  { %v245_v8 = vadd.f32 %v229_v55, %v164_v62  ;;  %v172_v9 = vadd.f32 %v156_v0, %v91_v63  ;;  %v279_v11 = vmul.f32 %v596_v60, %v700_v1  ;;  %v68_v14 = vadd.f32 %v705_v2, %v46_v6  ;;  %v605_v58 = vld [vmem:[%s1092_s0 + $0x1f0] sm:$0xff]  ;;  %v566_v0 = vld [vmem:[%s1092_s0 + $0xb8] sm:$0xff] }
  0x2a   :  { %v318_v13 = vmax.f32 %v302_v5, 0.0  ;;  %v133_v15 = vadd.f32 %v705_v2, %v117_v7  ;;  %v54_v16 = vmul.f32 %v700_v1, %v32_v3  ;;  %v214_v20 = vadd.f32 %v705_v2, %v198_v10 }
  0x2b   :  { %v326_v18 = vadd.f32 %v310_v56, %v245_v8  ;;  %v253_v19 = vadd.f32 %v237_v4, %v172_v9  ;;  %v295_v21 = vadd.f32 %v705_v2, %v279_v11  ;;  %v84_v23 = vmax.f32 %v68_v14, 0.0  ;;  %v582_v11 = vld [vmem:[%s1092_s0 + $0x138] sm:$0xff] }
  0x2c   :  { %v149_v24 = vmax.f32 %v133_v15, 0.0  ;;  %v76_v25 = vadd.f32 %v705_v2, %v54_v16  ;;  %v125_v26 = vmul.f32 %v572_v12, %v700_v1  ;;  %v230_v31 = vmax.f32 %v214_v20, 0.0  ;;  %v598_v16 = vld [vmem:[%s1092_s0 + $0x1b8] sm:$0xff] }
  0x2d   :  { %649 = vmatprep.mubr.msk.f32.mxu0 %vm339_vm1, %v326_v18  ;;  %v334_v30 = vadd.f32 %v318_v13, %v253_v19  ;;  %v311_v32 = vmax.f32 %v295_v21, 0.0  ;;  %v206_v33 = vmul.f32 %v588_v17, %v700_v1  ;;  %v287_v38 = vmul.f32 %v604_v22, %v700_v1  ;;  %v34_v21 = vld [vmem:[%s1092_s0 + $0x78] sm:$0xff] }
  0x2e   :  { %v165_v35 = vadd.f32 %v149_v24, %v84_v23  ;;  %v92_v36 = vmax.f32 %v76_v25, 0.0  ;;  %v141_v37 = vadd.f32 %v705_v2, %v125_v26  ;;  %v47_v40 = vmul.f32 %v700_v1, %v25_v27  ;;  %v574_v26 = vld [vmem:[%s1092_s0 + $0xf8] sm:$0xff] }
  0x2f   :  { %661 = vmatprep.mubr.msk.f32.mxu1 %vm339_vm1, %v334_v30  ;;  %v222_v39 = vadd.f32 %v705_v2, %v206_v33  ;;  %v118_v41 = vmul.f32 %v565_v28, %v700_v1  ;;  %v199_v42 = vmul.f32 %v581_v29, %v700_v1  ;;  %v303_v45 = vadd.f32 %v705_v2, %v287_v38  ;;  %v590_v27 = vld [vmem:[%s1092_s0 + $0x178] sm:$0xff] }
  0x30   :  { %v246_v43 = vadd.f32 %v230_v31, %v165_v35  ;;  %v157_v44 = vmax.f32 %v141_v37, 0.0  ;;  %v280_v46 = vmul.f32 %v597_v34, %v700_v1  ;;  %v69_v49 = vadd.f32 %v705_v2, %v47_v40  ;;  %v606_v28 = vld [vmem:[%s1092_s0 + $0x1f8] sm:$0xff] }
  0x31   :  { %v238_v48 = vmax.f32 %v222_v39, 0.0  ;;  %v134_v50 = vadd.f32 %v705_v2, %v118_v41  ;;  %v215_v51 = vadd.f32 %v705_v2, %v199_v42  ;;  %v319_v56 = vmax.f32 %v303_v45, 0.0 }
  0x32   :  { %v327_v54 = vadd.f32 %v311_v32, %v246_v43  ;;  %v173_v55 = vadd.f32 %v157_v44, %v92_v36  ;;  %v296_v57 = vadd.f32 %v705_v2, %v280_v46  ;;  %v85_v60 = vmax.f32 %v69_v49, 0.0 }
  0x33   :  { %v150_v61 = vmax.f32 %v134_v50, 0.0  ;;  %v231_v62 = vmax.f32 %v215_v51, 0.0  ;;  %v55_v63 = vmul.f32 %v700_v1, %v33_v47  ;;  %v126_v5 = vmul.f32 %v573_v52, %v700_v1 }
  0x34   :  { %650 = vmatmul.mubr.msk.f32.gmra.mrb[4].mxu0 %vm339_vm1, %v327_v54  ;;  %v254_v3 = vadd.f32 %v238_v48, %v173_v55  ;;  %v312_v4 = vmax.f32 %v296_v57, 0.0  ;;  %v207_v6 = vmul.f32 %v589_v53, %v700_v1  ;;  %v288_v9 = vmul.f32 %v605_v58, %v700_v1 }
  0x35   :  { %v166_v7 = vadd.f32 %v150_v61, %v85_v60  ;;  %v77_v8 = vadd.f32 %v705_v2, %v55_v63  ;;  %v48_v10 = vmul.f32 %v700_v1, %v26_v59  ;;  %v142_v13 = vadd.f32 %v705_v2, %v126_v5 }
  0x36   :  { %v335_v12 = vadd.f32 %v319_v56, %v254_v3  ;;  %v223_v14 = vadd.f32 %v705_v2, %v207_v6  ;;  %v119_v15 = vmul.f32 %v566_v0, %v700_v1  ;;  %v304_v19 = vadd.f32 %v705_v2, %v288_v9 }
  0x37   :  { %v247_v17 = vadd.f32 %v231_v62, %v166_v7  ;;  %v93_v18 = vmax.f32 %v77_v8, 0.0  ;;  %v70_v20 = vadd.f32 %v705_v2, %v48_v10  ;;  %v158_v22 = vmax.f32 %v142_v13, 0.0 }
  0x38   :  { %662 = vmatmul.mubr.msk.f32.gmra.mrb[4].mxu1 %vm339_vm1, %v335_v12  ;;  %v239_v23 = vmax.f32 %v223_v14, 0.0  ;;  %v135_v24 = vadd.f32 %v705_v2, %v119_v15  ;;  %v200_v25 = vmul.f32 %v582_v11, %v700_v1  ;;  %v320_v30 = vmax.f32 %v304_v19, 0.0 }
  0x39   :  { %v328_v29 = vadd.f32 %v312_v4, %v247_v17  ;;  %v86_v31 = vmax.f32 %v70_v20, 0.0  ;;  %v281_v32 = vmul.f32 %v598_v16, %v700_v1  ;;  %v174_v33 = vadd.f32 %v158_v22, %v93_v18 }
  0x3a   :  { %v151_v34 = vmax.f32 %v135_v24, 0.0  ;;  %v216_v35 = vadd.f32 %v705_v2, %v200_v25  ;;  %v56_v36 = vmul.f32 %v700_v1, %v34_v21  ;;  %v127_v38 = vmul.f32 %v574_v26, %v700_v1 }
  0x3b   :  { %652 = vmatprep.mubr.msk.f32.mxu0 %vm339_vm1, %v328_v29  ;;  %v297_v37 = vadd.f32 %v705_v2, %v281_v32  ;;  %v208_v39 = vmul.f32 %v590_v27, %v700_v1  ;;  %v289_v40 = vmul.f32 %v606_v28, %v700_v1  ;;  %v255_v41 = vadd.f32 %v239_v23, %v174_v33 }
  0x3c   :  { %v167_v42 = vadd.f32 %v151_v34, %v86_v31  ;;  %v232_v43 = vmax.f32 %v216_v35, 0.0  ;;  %v78_v44 = vadd.f32 %v705_v2, %v56_v36  ;;  %v143_v46 = vadd.f32 %v705_v2, %v127_v38 }
  0x3d   :  { %v313_v45 = vmax.f32 %v297_v37, 0.0  ;;  %v224_v47 = vadd.f32 %v705_v2, %v208_v39  ;;  %v305_v48 = vadd.f32 %v705_v2, %v289_v40  ;;  %v336_v49 = vadd.f32 %v320_v30, %v255_v41 }
  0x3e   :  { %v248_v50 = vadd.f32 %v232_v43, %v167_v42  ;;  %v94_v51 = vmax.f32 %v78_v44, 0.0  ;;  %v159_v52 = vmax.f32 %v143_v46, 0.0 }
  0x3f   :  { %v240_v53 = vmax.f32 %v224_v47, 0.0  ;;  %664 = vmatprep.mubr.msk.f32.mxu1 %vm339_vm1, %v336_v49  ;;  %v321_v55 = vmax.f32 %v305_v48, 0.0 }
  0x40   :  { %v329_v1 = vadd.f32 %v313_v45, %v248_v50  ;;  %v175_v54 = vadd.f32 %v159_v52, %v94_v51 }
  0x42   :  { %653 = vmatmul.mubr.msk.f32.gmra.mrb[6].mxu0 %vm339_vm1, %v329_v1  ;;  %v256_v56 = vadd.f32 %v240_v53, %v175_v54 }
  0x44   :  { %v337_v57 = vadd.f32 %v321_v55, %v256_v56 }
  0x46   :  { %665 = vmatmul.mubr.msk.f32.gmra.mrb[6].mxu1 %vm339_vm1, %v337_v57 }
  0xe8   :  { %v645_v58 = vpop.f32.mrb[0].mxu0 }
  0xe9   :  { %538 = vst [vmem:[%s1095_s4 + $0x8] sm:$0xff] %v645_v58  ;;  %v458_v2 = vpop.f32.mrb[1].mxu0 }
  0xea   :  { %537 = vst [vmem:[%s1095_s4] sm:$0xff] %v458_v2 }
  0xed   :  { %v657_v59 = vpop.f32.mrb[0].mxu1 }
  0xee   :  { %546 = vst [vmem:[%s1095_s4 + $0x48] sm:$0xff] %v657_v59  ;;  %v498_v60 = vpop.f32.mrb[1].mxu1 }
  0xef   :  { %545 = vst [vmem:[%s1095_s4 + $0x40] sm:$0xff] %v498_v60 }
  0xf7   :  { %v648_v61 = vpop.f32.mrb[2].mxu0 }
  0xf8   :  { %540 = vst [vmem:[%s1095_s4 + $0x18] sm:$0xff] %v648_v61  ;;  %v468_v62 = vpop.f32.mrb[3].mxu0 }
  0xf9   :  { %539 = vst [vmem:[%s1095_s4 + $0x10] sm:$0xff] %v468_v62 }
  0xfb   :  { %v660_v63 = vpop.f32.mrb[2].mxu1 }
  0xfc   :  { %548 = vst [vmem:[%s1095_s4 + $0x58] sm:$0xff] %v660_v63  ;;  %v508_v0 = vpop.f32.mrb[3].mxu1 }
  0xfd   :  { %547 = vst [vmem:[%s1095_s4 + $0x50] sm:$0xff] %v508_v0 }
 0x107   :  { %v651_v3 = vpop.f32.mrb[4].mxu0 }
 0x108   :  { %542 = vst [vmem:[%s1095_s4 + $0x28] sm:$0xff] %v651_v3  ;;  %v478_v4 = vpop.f32.mrb[5].mxu0 }
 0x109   :  { %541 = vst [vmem:[%s1095_s4 + $0x20] sm:$0xff] %v478_v4 }
 0x10b   :  { %v663_v5 = vpop.f32.mrb[4].mxu1 }
 0x10c   :  { %550 = vst [vmem:[%s1095_s4 + $0x68] sm:$0xff] %v663_v5  ;;  %v518_v6 = vpop.f32.mrb[5].mxu1 }
 0x10d   :  { %549 = vst [vmem:[%s1095_s4 + $0x60] sm:$0xff] %v518_v6 }
 0x115   :  { %v654_v7 = vpop.f32.mrb[6].mxu0 }
 0x116   :  { %544 = vst [vmem:[%s1095_s4 + $0x38] sm:$0xff] %v654_v7  ;;  %v488_v8 = vpop.f32.mrb[7].mxu0 }
 0x117   :  { %543 = vst [vmem:[%s1095_s4 + $0x30] sm:$0xff] %v488_v8 }
 0x119   :  { %v666_v9 = vpop.f32.mrb[6].mxu1 }
 0x11a   :  { %552 = vst [vmem:[%s1095_s4 + $0x78] sm:$0xff] %v666_v9  ;;  %v528_v10 = vpop.f32.mrb[7].mxu1 }
 0x11b   :  { %551 = vst [vmem:[%s1095_s4 + $0x70] sm:$0xff] %v528_v10 }

</bundles_post_ra>
